<compile_context>
chip_gen: v7x
topology: tpu7x:2x2x1
jax: 0.10.0
libtpu: 0.0.40
codegen_flags: <defaults>
</compile_context>

<pallas_src>
import functools

import jax
import jax.numpy as jnp
from jax.experimental import pallas as pl
from jax.experimental.pallas import tpu as pltpu


LANE = 128
ROW_TILE_MAX = 256                      # sublane-axis tile (rows = B*C)
TARGET_BLOCK_BYTES = 4 * 1024 * 1024    # per input block (Pallas double-buffers it)
SMALL_INPUT_BYTES = 1 << 20             # below this, skip the kernel launch


def _round_up(x, m):
    return ((x + m - 1) // m) * m


def _spatial_mean_kernel(x_ref, o_ref, acc_ref, *, inv_hw):
    """Accumulate row sums over the spatial (lane) axis across grid dim 1."""
    k = pl.program_id(1)

    @pl.when(k == 0)
    def _():
        acc_ref[...] = jnp.zeros_like(acc_ref)

    # Sum straight into f32; avoids materializing an f32 copy of the whole tile
    # on chips without a bf16 VALU (v5e).
    acc_ref[...] += jnp.sum(x_ref[...], axis=-1, keepdims=True, dtype=jnp.float32)

    @pl.when(k == pl.num_programs(1) - 1)
    def _():
        o_ref[...] = (acc_ref[...] * inv_hw).astype(o_ref.dtype)


def spatial_mean_pool(x, *, force_pallas=False, max_hw_tile=None):
    """x: (B, C, *spatial) -> (B, C), mean over all spatial dims."""
    B, C = x.shape[0], x.shape[1]
    hw = 1
    for d in x.shape[2:]:
        hw *= d

    dtype = x.dtype
    itemsize = jnp.dtype(dtype).itemsize
    x_flat = x.reshape(B * C, hw)

    # Fast path: for tiny tensors the fixed pallas_call / grid-step overhead
    # dominates and plain XLA (which also fuses with neighbors) is faster.
    if not force_pallas and x_flat.size * itemsize < SMALL_INPUT_BYTES:
        return jnp.mean(x_flat.astype(jnp.float32), axis=-1).astype(dtype).reshape(B, C)

    R = B * C
    # Sublane multiple depends on packing: f32 -> 8, bf16 -> 16, int8/fp8 -> 32.
    sub = {4: 8, 2: 16, 1: 32}.get(itemsize, 8)
    row_tile = min(ROW_TILE_MAX, _round_up(R, sub))
    r_pad = _round_up(R, row_tile)

    # Spatial tile: lane-aligned, sized so one block stays ~TARGET_BLOCK_BYTES
    # (well under the 32 MiB scoped default and v7x's 64 MiB physical VMEM,
    # while big enough to sit near the HBM roofline).
    hw_tile_cap = max(LANE, (TARGET_BLOCK_BYTES // (row_tile * itemsize)) // LANE * LANE)
    if max_hw_tile is not None:
        hw_tile_cap = max(LANE, min(hw_tile_cap, (max_hw_tile // LANE) * LANE))
    hw_128 = _round_up(hw, LANE)
    k_steps = pl.cdiv(hw_128, hw_tile_cap)
    hw_tile = _round_up(pl.cdiv(hw_128, k_steps), LANE)
    hw_pad = hw_tile * k_steps

    # Zero-pad so tiles divide evenly: zeros don't change the running sum and
    # padded rows are sliced off below.
    # TODO(synk): for very large inputs an in-kernel lane mask would avoid this
    # extra HBM pad copy.
    if (r_pad, hw_pad) != (R, hw):
        x_flat = jnp.pad(x_flat, ((0, r_pad - R), (0, hw_pad - hw)))

    kernel = functools.partial(_spatial_mean_kernel, inv_hw=1.0 / float(hw))

    out = pl.pallas_call(
        kernel,
        out_shape=jax.ShapeDtypeStruct((r_pad, 1), dtype),
        grid_spec=pltpu.PrefetchScalarGridSpec(
            num_scalar_prefetch=0,
            grid=(r_pad // row_tile, k_steps),
            in_specs=[pl.BlockSpec((row_tile, hw_tile), lambda r, k: (r, k))],
            out_specs=pl.BlockSpec((row_tile, 1), lambda r, k: (r, 0)),
            scratch_shapes=[pltpu.VMEM((row_tile, 1), jnp.float32)],
        ),
        compiler_params=pltpu.CompilerParams(
            dimension_semantics=("parallel", "arbitrary"),
            vmem_limit_bytes=48 * 1024 * 1024,
        ),
    )(x_flat)

    return out[:R, 0].reshape(B, C)


class SpatialMeanPool:
    """JAX/Pallas port of robomimic SpatialMeanPool. No learnable parameters."""

    def __init__(self, input_shape):
        assert len(input_shape) == 3  # (C, H, W), matching the PyTorch module
        self.in_shape = tuple(input_shape)

    def output_shape(self, input_shape=None):
        return list(self.in_shape[:1])

    def __call__(self, inputs, **kwargs):
        return spatial_mean_pool(inputs, **kwargs)


if __name__ == "__main__":
    key = jax.random.PRNGKey(0)

    def ref_mean(x):
        B, C = x.shape[0], x.shape[1]
        xf = x.reshape(B, C, -1).astype(jnp.float32)
        return jnp.mean(xf, axis=2).astype(x.dtype)

    tests = [
        # (shape, dtype, kwargs)
        ((2, 4, 16, 16), jnp.float32, {}),                    # canonical small case
        ((3, 5, 24, 24), jnp.float32, {"max_hw_tile": 128}),  # row+HW padding, multi-step accumulation
        ((2, 8, 32, 32), jnp.bfloat16, {}),                   # low-precision input, f32 accumulation
    ]

    for i, (shape, dtype, kw) in enumerate(tests):
        key, sub = jax.random.split(key)
        x = jax.random.normal(sub, shape, dtype=jnp.float32).astype(dtype)
        out = spatial_mean_pool(x, force_pallas=True, **kw)
        out = jax.block_until_ready(out)
        ref = ref_mean(x)
        tol = 1e-5 if dtype == jnp.float32 else 2e-2
        assert out.shape == (shape[0], shape[1]), (out.shape, shape)
        assert jnp.allclose(out.astype(jnp.float32), ref.astype(jnp.float32),
                            atol=tol, rtol=tol), f"test {i} mismatch"

    # Module interface (small inputs take the XLA fast path; semantics identical).
    module = SpatialMeanPool((4, 16, 16))
    xm = jax.random.normal(key, (2, 4, 16, 16), dtype=jnp.float32)
    om = jax.block_until_ready(module(xm))
    assert om.shape == (2, 4)
    assert jnp.allclose(om, ref_mean(xm), atol=1e-5, rtol=1e-5)
    assert module.output_shape() == [4]

    print("KERNEL_OK")
</pallas_src>

<mosaic_0001>
module attributes {stable_mosaic.version = 11 : i64} {
  func.func @_spatial_mean_kernel(%arg0: i32, %arg1: i32, %arg2: memref<8x256xf32, #tpu.memory_space<vmem>>, %arg3: memref<8x1xf32, #tpu.memory_space<vmem>>, %arg4: memref<8x1xf32, #tpu.memory_space<vmem>>) attributes {dimension_semantics = [#tpu.dimension_semantics<parallel>, #tpu.dimension_semantics<arbitrary>], iteration_bounds = array<i64: 1, 1>, scalar_prefetch = 0 : i64, scratch_operands = 1 : i64, tpu.core_type = #tpu.core_type<tc>, window_params = [{transform_indices = @transform_0, window_bounds = array<i64: 8, 256>}, {transform_indices = @transform_1, window_bounds = array<i64: 8, 1>}]} {
    %c0_i32 = arith.constant 0 : i32
    %0 = arith.cmpi eq, %arg1, %c0_i32 : i32
    %1 = arith.extui %0 : i1 to i32
    %c0_i32_0 = arith.constant 0 : i32
    %2 = arith.cmpi ne, %1, %c0_i32_0 : i32
    scf.if %2 {
      %cst_8 = arith.constant 0.000000e+00 : f32
      %12 = vector.broadcast %cst_8 : f32 to vector<8x1xf32>
      %c0_9 = arith.constant 0 : index
      %c0_10 = arith.constant 0 : index
      %13 = vector.load %arg4[%c0_9, %c0_10] : memref<8x1xf32, #tpu.memory_space<vmem>>, vector<8x1xf32>
      tpu.vector_store %arg4[%c0_9, %c0_10], %12 {strides = array<i32>} : memref<8x1xf32, #tpu.memory_space<vmem>>, vector<8x1xf32>,
    } else {
    }
    %c0 = arith.constant 0 : index
    %c0_1 = arith.constant 0 : index
    %3 = vector.load %arg4[%c0, %c0_1] : memref<8x1xf32, #tpu.memory_space<vmem>>, vector<8x1xf32>
    %c0_2 = arith.constant 0 : index
    %c0_3 = arith.constant 0 : index
    %4 = vector.load %arg2[%c0_2, %c0_3] : memref<8x256xf32, #tpu.memory_space<vmem>>, vector<8x256xf32>
    %cst = arith.constant dense<0.000000e+00> : vector<8xf32>
    %5 = vector.multi_reduction <add>, %4, %cst [1] : vector<8x256xf32> to vector<8xf32>
    %6 = vector.shape_cast %5 : vector<8xf32> to vector<8x1xf32>
    %7 = arith.addf %3, %6 : vector<8x1xf32>
    %c0_4 = arith.constant 0 : index
    %c0_5 = arith.constant 0 : index
    %8 = vector.load %arg4[%c0_4, %c0_5] : memref<8x1xf32, #tpu.memory_space<vmem>>, vector<8x1xf32>
    tpu.vector_store %arg4[%c0_4, %c0_5], %7 {strides = array<i32>} : memref<8x1xf32, #tpu.memory_space<vmem>>, vector<8x1xf32>,
    %c0_i32_6 = arith.constant 0 : i32
    %9 = arith.cmpi eq, %arg1, %c0_i32_6 : i32
    %10 = arith.extui %9 : i1 to i32
    %c0_i32_7 = arith.constant 0 : i32
    %11 = arith.cmpi ne, %10, %c0_i32_7 : i32
    scf.if %11 {
      %c0_8 = arith.constant 0 : index
      %c0_9 = arith.constant 0 : index
      %12 = vector.load %arg4[%c0_8, %c0_9] : memref<8x1xf32, #tpu.memory_space<vmem>>, vector<8x1xf32>
      %cst_10 = arith.constant 3.906250e-03 : f32
      %13 = vector.broadcast %cst_10 : f32 to vector<8x1xf32>
      %14 = arith.mulf %12, %13 : vector<8x1xf32>
      %c0_11 = arith.constant 0 : index
      %c0_12 = arith.constant 0 : index
      %15 = vector.load %arg3[%c0_11, %c0_12] : memref<8x1xf32, #tpu.memory_space<vmem>>, vector<8x1xf32>
      tpu.vector_store %arg3[%c0_11, %c0_12], %14 {strides = array<i32>} : memref<8x1xf32, #tpu.memory_space<vmem>>, vector<8x1xf32>,
    } else {
    }
    return
  }
  func.func @transform_0(%arg0: i32, %arg1: i32) -> (i32, i32) {
    %c0_i32 = arith.constant 0 : i32
    return %arg0, %arg1 : i32, i32
  }
  func.func @transform_1(%arg0: i32, %arg1: i32) -> (i32, i32) {
    %c0_i32 = arith.constant 0 : i32
    %c0_i32_0 = arith.constant 0 : i32
    return %arg0, %c0_i32 : i32, i32
  }
}

</mosaic_0001>

<bundles_post_ra>
// kernel: tpu_custom_call.1
= control target key start
LH: loop header
LB: loop body
LE: loop exit
PB: predicated region body
PF: predicated region fallthrough
CT: control target
= control target key end

     0   :  { %6 = vsyncpa [#allocation4], 0  ;;  %s72_s6 = smov [#allocation3]   ;;  %s99_s0 = inlined_call_operand.hbm [shape: f32[8,256], index: 0, kind: input, shape index: {}]   ;;  %s100_s1 = inlined_call_operand.vmem [shape: f32[8,1], index: 1, kind: output, shape index: {}]  }
   0x1   :  { %s13_s7 = sshll.u32 %s72_s6, 4  ;;  %s48_s10 = scalar_lea.hbm %s99_s0, 256  ;;  %s14_s7 = int_to_ptr.vmem [resolvable:$true] %s13_s7 }
   0x2   :  { %p49_p0 = scmp.ne.s32.totalorder %s99_s0, %s48_s10  ;;  %p52_p1 = scmp.lt.u32.totalorder %s48_s10, %s99_s0 }
   0x4   :  { %p54_p2 = pnand %p52_p1, %p49_p0 }
   0x6   :  { %57 = shalt.err (!%p54_p2)
}
   0x7   :  { %s58_s15 = scalar_lea.vmem %s14_s7, 256  ;;  %p63_p4 = scmp.lt.s32.totalorder %s14_s7, %s14_s7 }
   0x8   :  { %p59_p3 = scmp.ne.s32.totalorder %s14_s7, %s58_s15  ;;  %p64_p5 = scmp.lt.s32.totalorder %s58_s15, %s58_s15 }
   0xa   :  { %p65_p6 = por %p64_p5, %p63_p4 }
   0xc   :  { %p66_p7 = pnand %p65_p6, %p59_p3 }
   0xe   :  { %69 = shalt.err (!%p66_p7)
}
   0xf   :  { %16 = dma.hbm_to_vmem [thread:$0]  %s99_s0, 256, %s14_s7, [#allocation4]  }
  0x10   :  { %70 = dma.done.wait [#allocation4], 256  }
  0x11   :  { %71 = vsyncadd [#allocation4], 4294967040  ;;  %vm24_vm0 = vcmask 7168   ;;  %v73_v0 = vmov 0.0   ;;  %v27_v1 = vld [vmem:[#allocation3] sm:$0xff]  ;;  %v28_v2 = vld [vmem:[#allocation3 + $0x8] sm:$0xff] }
  0x12   :  { %25 = vst.msk [vmem:[#allocation2] sm:$0xff] %vm24_vm0, %v73_v0  ;;  %v29_v3 = vadd.f32 %v28_v2, %v27_v1 }
  0x14   :  { %30 = vadd.xlane.f32.xlu0 %v29_v3 }
  0x19   :  { %v26_v4 = vld [vmem:[#allocation2] sm:$0xff] }
  0xa1   :  { %v31_v5 = vpop.xlane.xlu0 %30 }
  0xa2   :  { %v32_v6 = vadd.f32 %v31_v5, %v26_v4 }
  0xa4   :  { %34 = vst.msk [vmem:[#allocation2] sm:$0xff] %vm24_vm0, %v32_v6 }
  0xab   :  { %v38_v7 = vld [vmem:[#allocation2] sm:$0xff] }
  0xac   :  { %v39_v8 = vmul.f32 0.00390625, %v38_v7 }
  0xae   :  { %40 = vst.msk [vmem:[%s100_s1] sm:$0xff] %vm24_vm0, %v39_v8 }
  0xaf   :  { %45 = vsyncpa [#allocation4], 1 }

</bundles_post_ra>
